<compile_context>
chip_gen: v6e
topology: v6e:2x2x1
jax: 0.10.0
libtpu: 0.0.40
codegen_flags: <defaults>
</compile_context>

<pallas_src>
import functools

import jax
import jax.numpy as jnp
from jax import lax
from jax.experimental import pallas as pl
from jax.experimental.pallas import tpu as pltpu

FEATURES = 64   # `features` in the PyTorch module


# ------------------------------ Pallas kernel ------------------------------- #

def _conv3x3_bn_relu_kernel(x_ref, w_ref, m_ref, b_ref, o_ref, maps_ref, *,
                            cin, H, W):
    """Fused conv3x3(pad=1, no bias) + folded BN + ReLU for one image.

    x_ref   : (cin, H*W)    f32   image in native NCHW order (spatial flattened)
    w_ref   : (cout, K)     bf16  BN-scale-folded weight, K = 9*cin zero-padded
    m_ref   : (9, H*W)      f32   per-tap SAME-padding border masks
    b_ref   : (cout, 1)     f32   BN shift (beta - mean*scale)
    o_ref   : (cout, H*W)   f32   lane-dense output (NCHW flattened)
    maps_ref: (K, H*W)      bf16  scratch: shifted-activation matmul RHS
    """
    HW = H * W
    taps = 9 * cin
    k_pad = maps_ref.shape[0]

    # Zero only the K-padding rows (tap rows are fully overwritten below).
    # Unconditional on purpose: safe under "parallel" grid sharding across cores.
    if k_pad > taps:
        maps_ref[taps:, :] = jnp.zeros((k_pad - taps, HW), jnp.bfloat16)

    x = x_ref[...]                                   # (cin, HW) f32
    for dy in (-1, 0, 1):
        for dx in (-1, 0, 1):
            tap = (dy + 1) * 3 + (dx + 1)
            s = dy * W + dx                          # flattened spatial shift
            if dy == 0 and dx == 0:
                val = x                              # center tap: no shift/mask
            else:
                shifted = pltpu.roll(x, (-s) % HW, axis=1)     # XLU lane rotate
                val = shifted * m_ref[tap:tap + 1, :]          # zero the border
            maps_ref[tap * cin:(tap + 1) * cin, :] = val.astype(jnp.bfloat16)

    # Single fused MXU matmul over all taps and input channels.
    acc = jnp.dot(w_ref[...], maps_ref[...],
                  preferred_element_type=jnp.float32)          # (cout, HW) f32

    # Epilogue: BN shift (scale already folded into the weight) + ReLU.
    o_ref[...] = jnp.maximum(acc + b_ref[...], 0.0)


def conv_bn_relu_first(x_nchw, w_mat_pad, tap_masks, shift_col):
    """relu(bn(conv3x3(x))) with eval-mode BN folded into weight/shift."""
    N, cin, H, W = x_nchw.shape
    cout, k_pad = w_mat_pad.shape
    HW = H * W
    assert tap_masks.shape == (9, HW)
    assert k_pad >= 9 * cin

    # Pure reshape (no transpose, no copy): stay in NCHW memory order.
    x = x_nchw.reshape(N, cin, HW)

    kern = functools.partial(_conv3x3_bn_relu_kernel, cin=cin, H=H, W=W)
    out = pl.pallas_call(
        kern,
        out_shape=jax.ShapeDtypeStruct((N, cout, HW), jnp.float32),
        grid=(N,),
        in_specs=[
            pl.BlockSpec((None, cin, HW), lambda n: (n, 0, 0)),   # image n
            pl.BlockSpec((cout, k_pad), lambda n: (0, 0)),        # weight
            pl.BlockSpec((9, HW), lambda n: (0, 0)),              # tap masks
            pl.BlockSpec((cout, 1), lambda n: (0, 0)),            # BN shift
        ],
        out_specs=pl.BlockSpec((None, cout, HW), lambda n: (n, 0, 0)),
        scratch_shapes=[pltpu.VMEM((k_pad, HW), jnp.bfloat16)],
        compiler_params=pltpu.CompilerParams(
            dimension_semantics=("parallel",)),
    )(x, w_mat_pad, tap_masks, shift_col)

    # Free reshape back to NCHW — no transpose needed.
    return out.reshape(N, cout, H, W)


# --------------------------- parameter preparation -------------------------- #

def build_tap_masks(H, W):
    """(9, H*W) f32 masks: 1 where the (dy,dx)-shifted read is in-bounds
    (reproduces 'SAME' zero padding after the circular lane roll)."""
    hw = jnp.arange(H * W, dtype=jnp.int32)
    hh, ww = hw // W, hw % W
    rows = []
    for dy in (-1, 0, 1):
        for dx in (-1, 0, 1):
            valid = ((hh + dy >= 0) & (hh + dy < H) &
                     (ww + dx >= 0) & (ww + dx < W))
            rows.append(valid.astype(jnp.float32))
    return jnp.stack(rows, axis=0)


def prepare_params(key, cin, cout, eps=1e-5):
    """Deterministic synthetic conv + BN parameters, pre-folded for the kernel."""
    kw_, kg, kb, km, kv = jax.random.split(key, 5)
    fan_in = 9 * cin
    bound = 1.0 / (fan_in ** 0.5)
    w_oihw = jax.random.uniform(kw_, (cout, cin, 3, 3), jnp.float32,
                                -bound, bound)                     # torch OIHW

    gamma = jax.random.uniform(kg, (cout,), jnp.float32, 0.5, 1.5)
    beta = 0.1 * jax.random.normal(kb, (cout,), jnp.float32)
    running_mean = 0.1 * jax.random.normal(km, (cout,), jnp.float32)
    running_var = jax.random.uniform(kv, (cout,), jnp.float32, 0.5, 1.5)

    scale = gamma / jnp.sqrt(running_var + eps)        # eval-mode BN fold
    shift = beta - running_mean * scale

    # Fold BN scale into the f32 weight BEFORE the bf16 cast.
    w_folded = w_oihw * scale[:, None, None, None]
    # (O,I,KH,KW) -> (O,KH,KW,I) -> (O, 9*I); column = ((dy*3)+dx)*cin + c.
    w_mat = jnp.transpose(w_folded, (0, 2, 3, 1)).reshape(cout, 9 * cin)
    # Zero-pad K to a 128-aligned contraction (stays within one MXU pass).
    k_pad = ((9 * cin + 127) // 128) * 128
    w_mat_pad = jnp.pad(w_mat, ((0, 0), (0, k_pad - 9 * cin)))

    return {
        "w_mat_pad": w_mat_pad.astype(jnp.bfloat16),          # kernel weight
        "w_folded_oihw_bf16": w_folded.astype(jnp.bfloat16),  # reference weight
        "shift_col": shift.reshape(cout, 1),
        "shift": shift,
    }


# ------------------------------- reference ---------------------------------- #

def reference(x_nchw, w_folded_oihw_bf16, shift):
    """XLA reference with the same bf16 operands / f32 accumulation."""
    y = lax.conv_general_dilated(
        x_nchw.astype(jnp.bfloat16), w_folded_oihw_bf16, (1, 1), 'SAME',
        dimension_numbers=('NCHW', 'OIHW', 'NCHW'),
        preferred_element_type=jnp.float32)
    y = y + shift[None, :, None, None]
    return jnp.maximum(y, 0.0)


# ---------------------------------- main ------------------------------------ #

if __name__ == "__main__":
    N, channels, H, W = 2, 4, 16, 16

    key = jax.random.PRNGKey(0)
    kx, kp = jax.random.split(key)
    x = jax.random.normal(kx, (N, channels, H, W), jnp.float32)

    params = prepare_params(kp, channels, FEATURES)
    tap_masks = build_tap_masks(H, W)

    fwd = jax.jit(conv_bn_relu_first)
    out = fwd(x, params["w_mat_pad"], tap_masks, params["shift_col"])
    jax.block_until_ready(out)

    assert out.shape == (N, FEATURES, H, W), out.shape
    assert out.dtype == jnp.float32

    ref = reference(x, params["w_folded_oihw_bf16"], params["shift"])
    max_err = float(jnp.max(jnp.abs(out - ref)))
    assert max_err < 1e-2, f"max abs err vs reference: {max_err}"

    print("KERNEL_OK")
</pallas_src>

<mosaic_0001>
module attributes {stable_mosaic.version = 11 : i64} {
  func.func @_conv3x3_bn_relu_kernel(%arg0: i32, %arg1: memref<1x4x256xf32, #tpu.memory_space<vmem>>, %arg2: memref<64x128xbf16, #tpu.memory_space<vmem>>, %arg3: memref<9x256xf32, #tpu.memory_space<vmem>>, %arg4: memref<64x1xf32, #tpu.memory_space<vmem>>, %arg5: memref<1x64x256xf32, #tpu.memory_space<vmem>>, %arg6: memref<128x256xbf16, #tpu.memory_space<vmem>>) attributes {dimension_semantics = [#tpu.dimension_semantics<parallel>], iteration_bounds = array<i64: 2>, scalar_prefetch = 0 : i64, scratch_operands = 1 : i64, tpu.core_type = #tpu.core_type<tc>, window_params = [{transform_indices = @transform_0, window_bounds = array<i64: 1, 4, 256>}, {pipeline_mode = #tpu.pipeline_mode<synchronous>, transform_indices = @transform_1, window_bounds = array<i64: 64, 128>}, {pipeline_mode = #tpu.pipeline_mode<synchronous>, transform_indices = @transform_2, window_bounds = array<i64: 9, 256>}, {pipeline_mode = #tpu.pipeline_mode<synchronous>, transform_indices = @transform_3, window_bounds = array<i64: 64, 1>}, {transform_indices = @transform_4, window_bounds = array<i64: 1, 64, 256>}]} {
    %cst = arith.constant 0.000000e+00 : bf16
    %0 = vector.broadcast %cst : bf16 to vector<92x256xbf16>
    %c36 = arith.constant 36 : index
    %c0 = arith.constant 0 : index
    %1 = vector.load %arg6[%c36, %c0] : memref<128x256xbf16, #tpu.memory_space<vmem>>, vector<92x256xbf16>
    tpu.vector_store %arg6[%c36, %c0], %0 {strides = array<i32>} : memref<128x256xbf16, #tpu.memory_space<vmem>>, vector<92x256xbf16>,
    %c0_0 = arith.constant 0 : index
    %c0_1 = arith.constant 0 : index
    %c0_2 = arith.constant 0 : index
    %2 = vector.load %arg1[%c0_0, %c0_1, %c0_2] : memref<1x4x256xf32, #tpu.memory_space<vmem>>, vector<1x4x256xf32>
    %3 = vector.shape_cast %2 : vector<1x4x256xf32> to vector<4x256xf32>
    %c17_i32 = arith.constant 17 : i32
    %4 = tpu.dynamic_rotate %3 by %c17_i32 dim 1 : vector<4x256xf32>, i32 -> vector<4x256xf32>
    %c0_3 = arith.constant 0 : index
    %c0_4 = arith.constant 0 : index
    %5 = vector.load %arg3[%c0_3, %c0_4] : memref<9x256xf32, #tpu.memory_space<vmem>>, vector<1x256xf32>
    %6 = vector.broadcast %5 : vector<1x256xf32> to vector<4x256xf32>
    %7 = arith.mulf %4, %6 : vector<4x256xf32>
    %8 = arith.truncf %7 : vector<4x256xf32> to vector<4x256xbf16>
    %c0_5 = arith.constant 0 : index
    %c0_6 = arith.constant 0 : index
    %9 = vector.load %arg6[%c0_5, %c0_6] : memref<128x256xbf16, #tpu.memory_space<vmem>>, vector<4x256xbf16>
    tpu.vector_store %arg6[%c0_5, %c0_6], %8 {strides = array<i32>} : memref<128x256xbf16, #tpu.memory_space<vmem>>, vector<4x256xbf16>,
    %c16_i32 = arith.constant 16 : i32
    %10 = tpu.dynamic_rotate %3 by %c16_i32 dim 1 : vector<4x256xf32>, i32 -> vector<4x256xf32>
    %c1 = arith.constant 1 : index
    %c0_7 = arith.constant 0 : index
    %11 = vector.load %arg3[%c1, %c0_7] : memref<9x256xf32, #tpu.memory_space<vmem>>, vector<1x256xf32>
    %12 = vector.broadcast %11 : vector<1x256xf32> to vector<4x256xf32>
    %13 = arith.mulf %10, %12 : vector<4x256xf32>
    %14 = arith.truncf %13 : vector<4x256xf32> to vector<4x256xbf16>
    %c4 = arith.constant 4 : index
    %c0_8 = arith.constant 0 : index
    %15 = vector.load %arg6[%c4, %c0_8] : memref<128x256xbf16, #tpu.memory_space<vmem>>, vector<4x256xbf16>
    tpu.vector_store %arg6[%c4, %c0_8], %14 {strides = array<i32>} : memref<128x256xbf16, #tpu.memory_space<vmem>>, vector<4x256xbf16>,
    %c15_i32 = arith.constant 15 : i32
    %16 = tpu.dynamic_rotate %3 by %c15_i32 dim 1 : vector<4x256xf32>, i32 -> vector<4x256xf32>
    %c2 = arith.constant 2 : index
    %c0_9 = arith.constant 0 : index
    %17 = vector.load %arg3[%c2, %c0_9] : memref<9x256xf32, #tpu.memory_space<vmem>>, vector<1x256xf32>
    %18 = vector.broadcast %17 : vector<1x256xf32> to vector<4x256xf32>
    %19 = arith.mulf %16, %18 : vector<4x256xf32>
    %20 = arith.truncf %19 : vector<4x256xf32> to vector<4x256xbf16>
    %c8 = arith.constant 8 : index
    %c0_10 = arith.constant 0 : index
    %21 = vector.load %arg6[%c8, %c0_10] : memref<128x256xbf16, #tpu.memory_space<vmem>>, vector<4x256xbf16>
    tpu.vector_store %arg6[%c8, %c0_10], %20 {strides = array<i32>} : memref<128x256xbf16, #tpu.memory_space<vmem>>, vector<4x256xbf16>,
    %c1_i32 = arith.constant 1 : i32
    %22 = tpu.dynamic_rotate %3 by %c1_i32 dim 1 : vector<4x256xf32>, i32 -> vector<4x256xf32>
    %c3 = arith.constant 3 : index
    %c0_11 = arith.constant 0 : index
    %23 = vector.load %arg3[%c3, %c0_11] : memref<9x256xf32, #tpu.memory_space<vmem>>, vector<1x256xf32>
    %24 = vector.broadcast %23 : vector<1x256xf32> to vector<4x256xf32>
    %25 = arith.mulf %22, %24 : vector<4x256xf32>
    %26 = arith.truncf %25 : vector<4x256xf32> to vector<4x256xbf16>
    %c12 = arith.constant 12 : index
    %c0_12 = arith.constant 0 : index
    %27 = vector.load %arg6[%c12, %c0_12] : memref<128x256xbf16, #tpu.memory_space<vmem>>, vector<4x256xbf16>
    tpu.vector_store %arg6[%c12, %c0_12], %26 {strides = array<i32>} : memref<128x256xbf16, #tpu.memory_space<vmem>>, vector<4x256xbf16>,
    %28 = arith.truncf %3 : vector<4x256xf32> to vector<4x256xbf16>
    %c16 = arith.constant 16 : index
    %c0_13 = arith.constant 0 : index
    %29 = vector.load %arg6[%c16, %c0_13] : memref<128x256xbf16, #tpu.memory_space<vmem>>, vector<4x256xbf16>
    tpu.vector_store %arg6[%c16, %c0_13], %28 {strides = array<i32>} : memref<128x256xbf16, #tpu.memory_space<vmem>>, vector<4x256xbf16>,
    %c255_i32 = arith.constant 255 : i32
    %30 = tpu.dynamic_rotate %3 by %c255_i32 dim 1 : vector<4x256xf32>, i32 -> vector<4x256xf32>
    %c5 = arith.constant 5 : index
    %c0_14 = arith.constant 0 : index
    %31 = vector.load %arg3[%c5, %c0_14] : memref<9x256xf32, #tpu.memory_space<vmem>>, vector<1x256xf32>
    %32 = vector.broadcast %31 : vector<1x256xf32> to vector<4x256xf32>
    %33 = arith.mulf %30, %32 : vector<4x256xf32>
    %34 = arith.truncf %33 : vector<4x256xf32> to vector<4x256xbf16>
    %c20 = arith.constant 20 : index
    %c0_15 = arith.constant 0 : index
    %35 = vector.load %arg6[%c20, %c0_15] : memref<128x256xbf16, #tpu.memory_space<vmem>>, vector<4x256xbf16>
    tpu.vector_store %arg6[%c20, %c0_15], %34 {strides = array<i32>} : memref<128x256xbf16, #tpu.memory_space<vmem>>, vector<4x256xbf16>,
    %c241_i32 = arith.constant 241 : i32
    %36 = tpu.dynamic_rotate %3 by %c241_i32 dim 1 : vector<4x256xf32>, i32 -> vector<4x256xf32>
    %c6 = arith.constant 6 : index
    %c0_16 = arith.constant 0 : index
    %37 = vector.load %arg3[%c6, %c0_16] : memref<9x256xf32, #tpu.memory_space<vmem>>, vector<1x256xf32>
    %38 = vector.broadcast %37 : vector<1x256xf32> to vector<4x256xf32>
    %39 = arith.mulf %36, %38 : vector<4x256xf32>
    %40 = arith.truncf %39 : vector<4x256xf32> to vector<4x256xbf16>
    %c24 = arith.constant 24 : index
    %c0_17 = arith.constant 0 : index
    %41 = vector.load %arg6[%c24, %c0_17] : memref<128x256xbf16, #tpu.memory_space<vmem>>, vector<4x256xbf16>
    tpu.vector_store %arg6[%c24, %c0_17], %40 {strides = array<i32>} : memref<128x256xbf16, #tpu.memory_space<vmem>>, vector<4x256xbf16>,
    %c240_i32 = arith.constant 240 : i32
    %42 = tpu.dynamic_rotate %3 by %c240_i32 dim 1 : vector<4x256xf32>, i32 -> vector<4x256xf32>
    %c7 = arith.constant 7 : index
    %c0_18 = arith.constant 0 : index
    %43 = vector.load %arg3[%c7, %c0_18] : memref<9x256xf32, #tpu.memory_space<vmem>>, vector<1x256xf32>
    %44 = vector.broadcast %43 : vector<1x256xf32> to vector<4x256xf32>
    %45 = arith.mulf %42, %44 : vector<4x256xf32>
    %46 = arith.truncf %45 : vector<4x256xf32> to vector<4x256xbf16>
    %c28 = arith.constant 28 : index
    %c0_19 = arith.constant 0 : index
    %47 = vector.load %arg6[%c28, %c0_19] : memref<128x256xbf16, #tpu.memory_space<vmem>>, vector<4x256xbf16>
    tpu.vector_store %arg6[%c28, %c0_19], %46 {strides = array<i32>} : memref<128x256xbf16, #tpu.memory_space<vmem>>, vector<4x256xbf16>,
    %c239_i32 = arith.constant 239 : i32
    %48 = tpu.dynamic_rotate %3 by %c239_i32 dim 1 : vector<4x256xf32>, i32 -> vector<4x256xf32>
    %c8_20 = arith.constant 8 : index
    %c0_21 = arith.constant 0 : index
    %49 = vector.load %arg3[%c8_20, %c0_21] : memref<9x256xf32, #tpu.memory_space<vmem>>, vector<1x256xf32>
    %50 = vector.broadcast %49 : vector<1x256xf32> to vector<4x256xf32>
    %51 = arith.mulf %48, %50 : vector<4x256xf32>
    %52 = arith.truncf %51 : vector<4x256xf32> to vector<4x256xbf16>
    %c32 = arith.constant 32 : index
    %c0_22 = arith.constant 0 : index
    %53 = vector.load %arg6[%c32, %c0_22] : memref<128x256xbf16, #tpu.memory_space<vmem>>, vector<4x256xbf16>
    tpu.vector_store %arg6[%c32, %c0_22], %52 {strides = array<i32>} : memref<128x256xbf16, #tpu.memory_space<vmem>>, vector<4x256xbf16>,
    %c0_23 = arith.constant 0 : index
    %c0_24 = arith.constant 0 : index
    %54 = vector.load %arg2[%c0_23, %c0_24] : memref<64x128xbf16, #tpu.memory_space<vmem>>, vector<64x128xbf16>
    %c0_25 = arith.constant 0 : index
    %c0_26 = arith.constant 0 : index
    %55 = vector.load %arg6[%c0_25, %c0_26] : memref<128x256xbf16, #tpu.memory_space<vmem>>, vector<128x256xbf16>
    %cst_27 = arith.constant dense<0.000000e+00> : vector<64x256xf32>
    %56 = tpu.matmul %54, %55, %cst_27 {dimension_numbers = #tpu.dot_dimension_numbers<[1], [0], [0], [1], [0, 0, 1, 1], [], []>} : vector<64x128xbf16>, vector<128x256xbf16>, vector<64x256xf32> -> vector<64x256xf32>
    %c0_28 = arith.constant 0 : index
    %c0_29 = arith.constant 0 : index
    %57 = vector.load %arg4[%c0_28, %c0_29] : memref<64x1xf32, #tpu.memory_space<vmem>>, vector<64x1xf32>
    %58 = vector.broadcast %57 : vector<64x1xf32> to vector<64x256xf32>
    %59 = arith.addf %56, %58 : vector<64x256xf32>
    %cst_30 = arith.constant 0.000000e+00 : f32
    %60 = vector.broadcast %cst_30 : f32 to vector<64x256xf32>
    %61 = arith.maximumf %59, %60 : vector<64x256xf32>
    %c0_31 = arith.constant 0 : index
    %c0_32 = arith.constant 0 : index
    %c0_33 = arith.constant 0 : index
    %62 = vector.load %arg5[%c0_31, %c0_32, %c0_33] : memref<1x64x256xf32, #tpu.memory_space<vmem>>, vector<1x64x256xf32>
    %63 = vector.shape_cast %62 : vector<1x64x256xf32> to vector<64x256xf32>
    %64 = vector.shape_cast %61 : vector<64x256xf32> to vector<1x64x256xf32>
    tpu.vector_store %arg5[%c0_31, %c0_32, %c0_33], %64 {strides = array<i32>} : memref<1x64x256xf32, #tpu.memory_space<vmem>>, vector<1x64x256xf32>,
    return
  }
  func.func @transform_0(%arg0: i32) -> (i32, i32, i32) {
    %c0_i32 = arith.constant 0 : i32
    %c0_i32_0 = arith.constant 0 : i32
    %c0_i32_1 = arith.constant 0 : i32
    return %arg0, %c0_i32, %c0_i32_0 : i32, i32, i32
  }
  func.func @transform_1(%arg0: i32) -> (i32, i32) {
    %c0_i32 = arith.constant 0 : i32
    %c0_i32_0 = arith.constant 0 : i32
    %c0_i32_1 = arith.constant 0 : i32
    return %c0_i32, %c0_i32_0 : i32, i32
  }
  func.func @transform_2(%arg0: i32) -> (i32, i32) {
    %c0_i32 = arith.constant 0 : i32
    %c0_i32_0 = arith.constant 0 : i32
    %c0_i32_1 = arith.constant 0 : i32
    return %c0_i32, %c0_i32_0 : i32, i32
  }
  func.func @transform_3(%arg0: i32) -> (i32, i32) {
    %c0_i32 = arith.constant 0 : i32
    %c0_i32_0 = arith.constant 0 : i32
    %c0_i32_1 = arith.constant 0 : i32
    return %c0_i32, %c0_i32_0 : i32, i32
  }
  func.func @transform_4(%arg0: i32) -> (i32, i32, i32) {
    %c0_i32 = arith.constant 0 : i32
    %c0_i32_0 = arith.constant 0 : i32
    %c0_i32_1 = arith.constant 0 : i32
    return %arg0, %c0_i32, %c0_i32_0 : i32, i32, i32
  }
}

</mosaic_0001>

<bundles_post_ra>
// kernel: conv_bn_relu_first.1
= control target key start
LH: loop header
LB: loop body
LE: loop exit
PB: predicated region body
PF: predicated region fallthrough
CT: control target
= control target key end

     0   :  { %s959_s15 = smov 0   ;;  %s1129_s0 = inlined_call_operand.vmem [shape: f32[2,4,256], index: 0, kind: input, shape index: {}]   ;;  %s1130_s1 = inlined_call_operand.vmem [shape: bf16[64,128], index: 1, kind: input, shape index: {}]   ;;  %s1131_s2 = inlined_call_operand.vmem [shape: f32[9,256], index: 2, kind: input, shape index: {}]   ;;  %s1132_s3 = inlined_call_operand.vmem [shape: f32[64,1], index: 3, kind: input, shape index: {}]   ;;  %s1133_s4 = inlined_call_operand.vmem [shape: f32[2,64,256], index: 4, kind: output, shape index: {}]  }
   0x1 LB: > { %s813_s16 = sadd.s32 4294967295, %s923_s15   ;;  %p817_p0 = scmp.ge.s32.totalorder %s923_s15, 1  ;;  %s923_s15 = sphi %s959_s15, %s14_s15  }
   0x2   : > { %p162_p1 = scmp.lt.s32.totalorder %s923_s15, 3 }
   0x4   : > { %p163_p2 = pnand %p817_p0, %p162_p1 }
   0x5   : > { %p188_p3 = scmp.lt.s32.totalorder (!%p163_p2), %s813_s16, 1  ;;  %s926_s21 = smov (!%p163_p2), 127  }
   0x6   : > { %166 = sbr.rel (%p163_p2) target bundleno = 389 (0x185), region = 36  ;;  %s927_s22 = smov (!%p163_p2), 111  }
   0x7   : > { %s928_s23 = smov (!%p163_p2), 112   ;;  %s929_s24 = smov (!%p163_p2), 113  }
   0x8   : > { %s930_s25 = smov (!%p163_p2), 16   ;;  %s931_s26 = smov (!%p163_p2), 1  }
   0x9   : > { %s932_s27 = smov (!%p163_p2), 17   ;;  %s933_s28 = smov (!%p163_p2), 15  }
   0xb   : > { %v925_v0 = vmov 0   ;;  %s1135_s16 = smov (!%p188_p3, %s813_s16), 1  ;;  %v502_v6 = vld [vmem:[%s1132_s3 + $0x8] sm:$0xff]  ;;  %v501_v7 = vld [vmem:[%s1132_s3] sm:$0xff]  ;;  %v503_v8 = vld [vmem:[%s1132_s3 + $0x10] sm:$0xff]  ;;  %v219_v14 = vlaneseq }
   0xc   : > { %v857_v1 = vcombine.high %v925_v0, %v925_v0  ;;  %199 = vst [vmem:[#allocation2 + $0x50] sm:$0xcc] %v925_v0  ;;  %v856_v2 = vcombine.low %v925_v0, %v925_v0  ;;  %685 = vmatprep.mubr.bf16.mxu0 %v925_v0  ;;  %705 = vmatprep.mubr.bf16.mxu1 %v925_v0  ;;  %s860_s17 = sshll.u32 %s1135_s16, 3  ;;  %v504_v9 = vld [vmem:[%s1132_s3 + $0x18] sm:$0xff]  ;;  %v505_v10 = vld [vmem:[%s1132_s3 + $0x20] sm:$0xff]  ;;  %v506_v11 = vld [vmem:[%s1132_s3 + $0x28] sm:$0xff] }
   0xd   : > { %905 = vset.pattern.permute.xlu1 %v925_v0  ;;  %904 = vset.pattern.permute.xlu0 %v925_v0  ;;  %s192_s20 = scalar_lea.vmem %s1129_s0, %s860_s17  ;;  %v507_v12 = vld [vmem:[%s1132_s3 + $0x30] sm:$0xff]  ;;  %v508_v13 = vld [vmem:[%s1132_s3 + $0x38] sm:$0xff]  ;;  %v227_v15 = vshrl.u32 %v219_v14, 7  ;;  %v1006_v16 = vand.u32 127, %v219_v14 }
   0xe   : > { %653 = vmatprep.subr.bf16.mxu0 %v857_v1  ;;  %871 = vmatprep.subr.bf16.mxu1 %v857_v1  ;;  %v211_v3 = vld [vmem:[%s192_s20] sm:$0xff]  ;;  %v836_v25 = vld [vmem:[%s1131_s2 + $0x10] ss:$8 sm:$0x3] }
   0xf   : > { %654 = vmatpush1.bf16.msra.mxu0 %v856_v2  ;;  %879 = vmatpush1.bf16.msra.mxu1 %v856_v2  ;;  %v213_v4 = vcombine.high %v211_v3, %v211_v3  ;;  %v1008_v17 = vsub.s32 0, %v227_v15  ;;  %v1010_v18 = vsub.s32 1, %v227_v15  ;;  %v830_v19 = vld [vmem:[%s1131_s2 + $0x5] ss:$8 sm:$0x3]  ;;  %vm355_vm0 = vcmp.lt.s32.totalorder %v1006_v16, 127 }
  0x10   : > { %655 = vmatprep.subr.bf16.mxu0 %v857_v1  ;;  %872 = vmatprep.subr.bf16.mxu1 %v857_v1  ;;  %v834_v24 = vld [vmem:[%s1131_s2 + $0x7] ss:$8 sm:$0x3]  ;;  %vm418_vm1 = vcmp.lt.s32.totalorder %v1006_v16, 112  ;;  %vm450_vm2 = vcmp.lt.s32.totalorder %v1006_v16, 111  ;;  %vm387_vm3 = vcmp.lt.s32.totalorder %v1006_v16, 113 }
  0x11   : > { %351 = vrot.lane.b32.xlu1 %v211_v3, %s926_s21  ;;  %446 = vrot.lane.b32.xlu0 %v211_v3, %s927_s22  ;;  %v866_v5 = vpack.c.bf16 %v213_v4, %v211_v3  ;;  %v364_v22 = vrot.slane %v830_v19, %v1008_v17  ;;  %v368_v23 = vrot.slane %v830_v19, %v1010_v18  ;;  %v832_v31 = vld [vmem:[%s1131_s2 + $0x6] ss:$8 sm:$0x3]  ;;  %v823_v50 = vld [vmem:[%s1131_s2 + $0x1] ss:$8 sm:$0x3] }
  0x12   : > { %v427_v30 = vrot.slane %v834_v24, %v1008_v17  ;;  %v431_v34 = vrot.slane %v834_v24, %v1010_v18  ;;  %v459_v35 = vrot.slane %v836_v25, %v1008_v17  ;;  %v463_v36 = vrot.slane %v836_v25, %v1010_v18  ;;  %v827_v63 = vld [vmem:[%s1131_s2 + $0x3] ss:$8 sm:$0x3]  ;;  %v825_v25 = vld [vmem:[%s1131_s2 + $0x2] ss:$8 sm:$0x3] }
  0x13   : > { %656 = vmatpush1.bf16.msra.mxu0 %v856_v2  ;;  %880 = vmatpush1.bf16.msra.mxu1 %v856_v2  ;;  %350 = vst [vmem:[#allocation2 + $0x18] sm:$0x33] %v866_v5  ;;  %v396_v40 = vrot.slane %v832_v31, %v1008_v17  ;;  %v400_v41 = vrot.slane %v832_v31, %v1010_v18  ;;  %vm251_vm4 = vcmp.lt.s32.totalorder %v1006_v16, 16  ;;  %vm314_vm5 = vcmp.lt.s32.totalorder %v1006_v16, 1 }
  0x14   : > { %657 = vmatprep.subr.bf16.mxu0 %v857_v1  ;;  %873 = vmatprep.subr.bf16.mxu1 %v857_v1  ;;  %v260_v58 = vrot.slane %v823_v50, %v1008_v17  ;;  %v264_v62 = vrot.slane %v823_v50, %v1010_v18  ;;  %vm221_vm6 = vcmp.lt.s32.totalorder %v1006_v16, 17  ;;  %vm283_vm7 = vcmp.lt.s32.totalorder %v1006_v16, 15  ;;  %v914_v16 = vld [vmem:[%s1130_s1 + $0x10] sm:$0xff]   ;;  %v916_v50 = vld [vmem:[%s1130_s1 + $0x18] sm:$0xff]  }
  0x15   : > { %414 = vrot.lane.b32.xlu0 %v211_v3, %s928_s23  ;;  %353 = vrot.lane.b32.xlu1 %v213_v4, %s926_s21  ;;  %s861_s21 = sshll.u32 %s1135_s16, 7 }
  0x17   : > { %658 = vmatpush1.bf16.msra.mxu0 %v856_v2  ;;  %881 = vmatpush1.bf16.msra.mxu1 %v856_v2 }
  0x18   : > { %659 = vmatprep.subr.bf16.mxu0 %v857_v1  ;;  %874 = vmatprep.subr.bf16.mxu1 %v857_v1 }
  0x19   : > { %416 = vrot.lane.b32.xlu1 %v213_v4, %s928_s23  ;;  %448 = vrot.lane.b32.xlu0 %v213_v4, %s927_s22 }
  0x1b   : > { %660 = vmatpush1.bf16.msra.mxu0 %v856_v2  ;;  %882 = vmatpush1.bf16.msra.mxu1 %v856_v2 }
  0x1c   : > { %661 = vmatprep.subr.bf16.mxu0 %v857_v1  ;;  %875 = vmatprep.subr.bf16.mxu1 %v857_v1 }
  0x1d   : > { %385 = vrot.lane.b32.xlu1 %v213_v4, %s929_s24  ;;  %383 = vrot.lane.b32.xlu0 %v211_v3, %s929_s24  ;;  %s1106_s24 = scalar_lea.vmem %s1133_s4, %s861_s21 }
  0x1f   : > { %662 = vmatpush1.bf16.msra.mxu0 %v856_v2  ;;  %883 = vmatpush1.bf16.msra.mxu1 %v856_v2 }
  0x21   : > { %249 = vrot.lane.b32.xlu1 %v213_v4, %s930_s25  ;;  %247 = vrot.lane.b32.xlu0 %v211_v3, %s930_s25 }
  0x25   : > { %312 = vrot.lane.b32.xlu1 %v213_v4, %s931_s26  ;;  %310 = vrot.lane.b32.xlu0 %v211_v3, %s931_s26 }
  0x29   : > { %217 = vrot.lane.b32.xlu1 %v213_v4, %s932_s27  ;;  %215 = vrot.lane.b32.xlu0 %v211_v3, %s932_s27 }
  0x2d   : > { %281 = vrot.lane.b32.xlu1 %v213_v4, %s933_s28  ;;  %279 = vrot.lane.b32.xlu0 %v211_v3, %s933_s28 }
  0x31   : > { %516 = vperm.xlu1 %905, %v502_v6   ;;  %511 = vperm.xlu0 %904, %v501_v7  }
  0x35   : > { %521 = vperm.xlu1 %905, %v503_v8   ;;  %526 = vperm.xlu0 %904, %v504_v9   ;;  %v323_v8 = vrot.slane %v827_v63, %v1008_v17  ;;  %v327_v9 = vrot.slane %v827_v63, %v1010_v18 }
  0x39   : > { %531 = vperm.xlu1 %905, %v505_v10   ;;  %536 = vperm.xlu0 %904, %v506_v11   ;;  %v224_v10 = vld [vmem:[%s1131_s2] ss:$8 sm:$0x3] }
  0x3a   : > { %v229_v19 = vrot.slane %v224_v10, %v1008_v17  ;;  %v233_v24 = vrot.slane %v224_v10, %v1010_v18 }
  0x3d   : > { %541 = vperm.xlu1 %905, %v507_v12   ;;  %546 = vperm.xlu0 %904, %v508_v13  }
  0x83   : > { %v352_v20 = vpop.permute.xlu1 %351  ;;  %v447_v21 = vpop.permute.xlu0 %446 }
  0x87   : > { %v415_v26 = vpop.permute.xlu0 %414  ;;  %v354_v27 = vpop.permute.xlu1 %353 }
  0x88   : > { %v356_v28 = vsel %vm355_vm0, %v352_v20, %v354_v27  ;;  %v357_v29 = vsel %vm355_vm0, %v354_v27, %v352_v20 }
  0x89   : > { %v371_v32 = vmul.f32 %v364_v22, %v356_v28  ;;  %v372_v33 = vmul.f32 %v368_v23, %v357_v29 }
  0x8b   : > { %v867_v37 = vpack.c.bf16 %v372_v33, %v371_v32  ;;  %v417_v38 = vpop.permute.xlu1 %416  ;;  %v449_v39 = vpop.permute.xlu0 %448  ;;  %v292_v33 = vrot.slane %v825_v25, %v1008_v17 }
  0x8c   : > { %v419_v42 = vsel %vm418_vm1, %v415_v26, %v417_v38  ;;  %v420_v43 = vsel %vm418_vm1, %v417_v38, %v415_v26  ;;  %v451_v44 = vsel %vm450_vm2, %v447_v21, %v449_v39  ;;  %v452_v45 = vsel %vm450_vm2, %v449_v39, %v447_v21 }
  0x8d   : > { %v380_v46 = vrot.slane %v867_v37, 6  ;;  %v434_v47 = vmul.f32 %v427_v30, %v419_v42  ;;  %v435_v48 = vmul.f32 %v431_v34, %v420_v43  ;;  %v466_v49 = vmul.f32 %v459_v35, %v451_v44 }
  0x8e   : > { %v467_v51 = vmul.f32 %v463_v36, %v452_v45  ;;  %v296_v38 = vrot.slane %v825_v25, %v1010_v18 }
  0x8f   : > { %382 = vst [vmem:[#allocation2 + $0x18] sm:$0xcc] %v380_v46  ;;  %v869_v52 = vpack.c.bf16 %v435_v48, %v434_v47  ;;  %v386_v53 = vpop.permute.xlu1 %385  ;;  %v384_v54 = vpop.permute.xlu0 %383  ;;  %v913_v48 = vld [vmem:[%s1130_s1] sm:$0xff]  }
  0x90   : > { %v870_v55 = vpack.c.bf16 %v467_v51, %v466_v49  ;;  %v388_v56 = vsel %vm387_vm3, %v384_v54, %v386_v53  ;;  %v389_v57 = vsel %vm387_vm3, %v386_v53, %v384_v54  ;;  %v915_v49 = vld [vmem:[%s1130_s1 + $0x8] sm:$0xff]  }
  0x91   : > { %v443_v59 = vrot.slane %v869_v52, 6  ;;  %v403_v60 = vmul.f32 %v396_v40, %v388_v56  ;;  %v404_v61 = vmul.f32 %v400_v41, %v389_v57 }
  0x92   : > { %476 = vst [vmem:[#allocation2 + $0x50] sm:$0x33] %v870_v55 }
  0x93   : > { %445 = vst [vmem:[#allocation2 + $0x48] sm:$0xcc] %v443_v59  ;;  %v868_v1 = vpack.c.bf16 %v404_v61, %v403_v60  ;;  %v250_v2 = vpop.permute.xlu1 %249  ;;  %v248_v3 = vpop.permute.xlu0 %247 }
  0x94   : > { %v252_v4 = vsel %vm251_vm4, %v248_v3, %v250_v2  ;;  %v253_v5 = vsel %vm251_vm4, %v250_v2, %v248_v3 }
  0x95   : > { %413 = vst [vmem:[#allocation2 + $0x48] sm:$0x33] %v868_v1  ;;  %v267_v6 = vmul.f32 %v260_v58, %v253_v5  ;;  %v268_v7 = vmul.f32 %v264_v62, %v252_v4 }
  0x97   : > { %v863_v11 = vpack.c.bf16 %v268_v7, %v267_v6  ;;  %v313_v12 = vpop.permute.xlu1 %312  ;;  %v311_v13 = vpop.permute.xlu0 %310 }
  0x98   : > { %v315_v14 = vsel %vm314_vm5, %v311_v13, %v313_v12  ;;  %v316_v15 = vsel %vm314_vm5, %v313_v12, %v311_v13 }
  0x99   : > { %v276_v20 = vrot.slane %v863_v11, 6  ;;  %v330_v21 = vmul.f32 %v323_v8, %v316_v15  ;;  %v331_v22 = vmul.f32 %v327_v9, %v315_v14  ;;  %v489_v23 = vld [vmem:[#allocation2 + $0x50] sm:$0xff] }
  0x9a   : > { %v847_v26 = vcombine.high %v489_v23, %v925_v0  ;;  %v846_v27 = vcombine.low %v489_v23, %v925_v0 }
  0x9b   : > { %278 = vst [vmem:[#allocation2] sm:$0xcc] %v276_v20  ;;  %v865_v28 = vpack.c.bf16 %v331_v22, %v330_v21  ;;  %v218_v29 = vpop.permute.xlu1 %217  ;;  %v216_v30 = vpop.permute.xlu0 %215 }
  0x9c   : > { %663 = vmatprep.subr.bf16.mxu0 %v847_v26  ;;  %876 = vmatprep.subr.bf16.mxu1 %v847_v26  ;;  %v222_v31 = vsel %vm221_vm6, %v216_v30, %v218_v29  ;;  %v223_v32 = vsel %vm221_vm6, %v218_v29, %v216_v30  ;;  %v907_v34 = vld [vmem:[#allocation2 + $0x1c] ss:$48 sps:$4 sm:$0xff]   ;;  %v909_v42 = vld [vmem:[#allocation2 + $0x18] ss:$48 sps:$4 sm:$0xff]  }
  0x9d   : > { %v339_v35 = vrot.slane %v865_v28, 6  ;;  %v236_v36 = vmul.f32 %v229_v19, %v223_v32  ;;  %v237_v37 = vmul.f32 %v233_v24, %v222_v31  ;;  %664 = vmatpush1.bf16.msra.mxu0 %v846_v27  ;;  %884 = vmatpush1.bf16.msra.mxu1 %v846_v27 }
  0x9e   : > { %665 = vmatprep.subr.bf16.mxu0 %v907_v34  ;;  %877 = vmatprep.subr.bf16.mxu1 %v907_v34 }
  0x9f   : > { %341 = vst [vmem:[#allocation2 + $0x10] sm:$0xcc] %v339_v35  ;;  %v862_v39 = vpack.c.bf16 %v237_v37, %v236_v36  ;;  %v282_v40 = vpop.permute.xlu1 %281  ;;  %v280_v41 = vpop.permute.xlu0 %279 }
  0xa0   : > { %v284_v43 = vsel %vm283_vm7, %v280_v41, %v282_v40  ;;  %v285_v17 = vsel %vm283_vm7, %v282_v40, %v280_v41 }
  0xa1   : > { %246 = vst [vmem:[#allocation2] sm:$0x33] %v862_v39  ;;  %v299_v44 = vmul.f32 %v292_v33, %v285_v17  ;;  %v300_v45 = vmul.f32 %v296_v38, %v284_v43  ;;  %666 = vmatpush1.bf16.msra.mxu0 %v909_v42  ;;  %885 = vmatpush1.bf16.msra.mxu1 %v909_v42 }
  0xa3   : > { %v864_v46 = vpack.c.bf16 %v300_v45, %v299_v44 }
  0xa5   : > { %309 = vst [vmem:[#allocation2 + $0x10] sm:$0x33] %v864_v46 }
  0xac   : > { %v910_v18 = vld [vmem:[#allocation2 + $0x4] ss:$16 sps:$4 sm:$0xff]   ;;  %v912_v47 = vld [vmem:[#allocation2] ss:$16 sps:$4 sm:$0xff]   ;;  %v517_v51 = vpop.permute.xlu1 %516  ;;  %v512_v52 = vpop.permute.xlu0 %511 }
  0xad   : > { %667 = vmatprep.subr.bf16.mxu0 %v910_v18  ;;  %878 = vmatprep.subr.bf16.mxu1 %v910_v18 }
  0xae   : > { %668 = vmatpush1.bf16.msra.mxu0 %v912_v47  ;;  %886 = vmatpush1.bf16.msra.mxu1 %v912_v47 }
  0xb0   : > { %v522_v53 = vpop.permute.xlu1 %521  ;;  %v1100_v54 = vpop.permute.xlu0 %526 }
  0xb1   : > { %686 = vmatmul.mubr.bf16.vlgmr.msra.gmra.mxu0 %v913_v48  ;;  %706 = vmatmul.mubr.bf16.vlgmr.msra.gmra.mxu1 %v914_v16 }
  0xb2   : > { %695 = vmatprep.mubr.bf16.mxu0 %v925_v0  ;;  %715 = vmatprep.mubr.bf16.mxu1 %v925_v0 }
  0xb4   : > { %v532_v55 = vpop.permute.xlu1 %531  ;;  %v537_v61 = vpop.permute.xlu0 %536 }
  0xb8   : > { %v542_v11 = vpop.permute.xlu1 %541  ;;  %v547_v27 = vpop.permute.xlu0 %546 }
  0xb9   : > { %696 = vmatmul.mubr.bf16.gmra.mxu0 %v915_v49  ;;  %716 = vmatmul.mubr.bf16.gmra.mxu1 %v916_v50 }
 0x171   : > { %v687_v56 = vpop.f32.mrf.mxu0  ;;  %v707_v57 = vpop.f32.mrf.mxu1 }
 0x172   : > { %v688_v0 = vadd.f32 %v687_v56, %v512_v52  ;;  %v708_v58 = vadd.f32 %v707_v57, %v532_v55 }
 0x173   : > { %v689_v59 = vpop.f32.mrf.mxu0  ;;  %v709_v60 = vpop.f32.mrf.mxu1 }
 0x174   : > { %v726_v62 = vmax.f32 %v688_v0, 0.0  ;;  %v734_v63 = vmax.f32 %v708_v58, 0.0  ;;  %v690_v1 = vadd.f32 %v689_v59, %v512_v52  ;;  %v710_v2 = vadd.f32 %v709_v60, %v532_v55 }
 0x175   : > { %v691_v3 = vpop.f32.mrf.mxu0  ;;  %v711_v4 = vpop.f32.mrf.mxu1 }
 0x176   : > { %742 = vst [vmem:[%s1106_s24] sm:$0xff] %v726_v62  ;;  %750 = vst [vmem:[%s1106_s24 + $0x40] sm:$0xff] %v734_v63  ;;  %v727_v5 = vmax.f32 %v690_v1, 0.0  ;;  %v735_v6 = vmax.f32 %v710_v2, 0.0  ;;  %v692_v7 = vadd.f32 %v691_v3, %v517_v51  ;;  %v712_v8 = vadd.f32 %v711_v4, %v537_v61 }
 0x177   : > { %v693_v9 = vpop.f32.mrf.mxu0  ;;  %v713_v10 = vpop.f32.mrf.mxu1 }
 0x178   : > { %743 = vst [vmem:[%s1106_s24 + $0x8] sm:$0xff] %v727_v5  ;;  %751 = vst [vmem:[%s1106_s24 + $0x48] sm:$0xff] %v735_v6  ;;  %v728_v12 = vmax.f32 %v692_v7, 0.0  ;;  %v736_v13 = vmax.f32 %v712_v8, 0.0  ;;  %v694_v14 = vadd.f32 %v693_v9, %v517_v51  ;;  %v714_v15 = vadd.f32 %v713_v10, %v537_v61 }
 0x179   : > { %v697_v19 = vpop.f32.mrf.mxu0  ;;  %v717_v20 = vpop.f32.mrf.mxu1 }
 0x17a   : > { %744 = vst [vmem:[%s1106_s24 + $0x10] sm:$0xff] %v728_v12  ;;  %752 = vst [vmem:[%s1106_s24 + $0x50] sm:$0xff] %v736_v13  ;;  %v729_v21 = vmax.f32 %v694_v14, 0.0  ;;  %v737_v22 = vmax.f32 %v714_v15, 0.0  ;;  %v698_v23 = vadd.f32 %v697_v19, %v522_v53  ;;  %v718_v24 = vadd.f32 %v717_v20, %v542_v11 }
 0x17b   : > { %v699_v25 = vpop.f32.mrf.mxu0  ;;  %v719_v26 = vpop.f32.mrf.mxu1 }
 0x17c   : > { %745 = vst [vmem:[%s1106_s24 + $0x18] sm:$0xff] %v729_v21  ;;  %753 = vst [vmem:[%s1106_s24 + $0x58] sm:$0xff] %v737_v22  ;;  %v730_v28 = vmax.f32 %v698_v23, 0.0  ;;  %v738_v29 = vmax.f32 %v718_v24, 0.0  ;;  %v700_v30 = vadd.f32 %v699_v25, %v522_v53  ;;  %v720_v31 = vadd.f32 %v719_v26, %v542_v11 }
 0x17d   : > { %v701_v32 = vpop.f32.mrf.mxu0  ;;  %v721_v33 = vpop.f32.mrf.mxu1 }
 0x17e   : > { %746 = vst [vmem:[%s1106_s24 + $0x20] sm:$0xff] %v730_v28  ;;  %754 = vst [vmem:[%s1106_s24 + $0x60] sm:$0xff] %v738_v29  ;;  %v731_v34 = vmax.f32 %v700_v30, 0.0  ;;  %v739_v35 = vmax.f32 %v720_v31, 0.0  ;;  %v702_v36 = vadd.f32 %v701_v32, %v1100_v54  ;;  %v722_v37 = vadd.f32 %v721_v33, %v547_v27 }
 0x17f   : > { %v703_v38 = vpop.f32.mrf.mxu0  ;;  %v723_v39 = vpop.f32.mrf.mxu1 }
 0x180   : > { %747 = vst [vmem:[%s1106_s24 + $0x28] sm:$0xff] %v731_v34  ;;  %755 = vst [vmem:[%s1106_s24 + $0x68] sm:$0xff] %v739_v35  ;;  %v732_v40 = vmax.f32 %v702_v36, 0.0  ;;  %v740_v41 = vmax.f32 %v722_v37, 0.0  ;;  %v704_v42 = vadd.f32 %v703_v38, %v1100_v54  ;;  %v724_v43 = vadd.f32 %v723_v39, %v547_v27 }
 0x182   : > { %748 = vst [vmem:[%s1106_s24 + $0x30] sm:$0xff] %v732_v40  ;;  %756 = vst [vmem:[%s1106_s24 + $0x70] sm:$0xff] %v740_v41  ;;  %v733_v17 = vmax.f32 %v704_v42, 0.0  ;;  %v741_v44 = vmax.f32 %v724_v43, 0.0 }
 0x184   : > { %749 = vst [vmem:[%s1106_s24 + $0x38] sm:$0xff] %v733_v17  ;;  %757 = vst [vmem:[%s1106_s24 + $0x78] sm:$0xff] %v741_v44 }
 0x185 PF: > { %s14_s15 = sadd.s32 1, %s923_s15  }
 0x186   : > { %p11_p4 = scmp.ge.s32.totalorder %s14_s15, 4  }
 0x188   :  { %13 = sbr.rel (!%p11_p4) target bundleno = 1 (0x1), region = 73 }

</bundles_post_ra>
